<compile_context>
chip_gen: v6e
topology: v6e:2x2x1
jax: 0.10.0
libtpu: 0.0.40
codegen_flags: <defaults>
</compile_context>

<pallas_src>
import math
import functools

import jax
import jax.numpy as jnp
from jax import lax
from jax.experimental import pallas as pl
from jax.experimental.pallas import tpu as pltpu


_NEG_LOG_1E4 = -math.log(10000.0)

# Per-output-block budgets.  The pipeline double-buffers the output, so the
# real footprint is ~2x these; an explicit vmem_limit_bytes is always set.
_BLOCK_BYTES_DEFAULT = 8 * 1024 * 1024      # v5e / v6e
_BLOCK_BYTES_HIGH_BW = 12 * 1024 * 1024     # v7x-class (3.2 TB/s HBM exposes
                                            # the ~0.35 us per-step overhead)
_FALLBACK_BLOCK_BYTES = 4 * 1024 * 1024     # masked-store fallback path
# Largest periodic chunk kept resident in VMEM (it is a pipelined input whose
# block index never changes, so it is fetched from HBM once per core).
_MAX_CHUNK_BYTES = 2 * 1024 * 1024
# Bytes per unrolled copy statement (<= 32 vregs -> no register pressure).
_COPY_BYTES = 128 * 1024


def _sublane(dtype):
    # Rows per vreg sublane group: 8 for 32-bit, 16 for 16-bit, 32 for 8-bit.
    return max(8, 32 // jnp.dtype(dtype).itemsize)


def _lcm(a, b):
    return a * b // math.gcd(a, b)


def _pick_block_bytes():
    """Bigger output tiles on high-bandwidth / small-VMEM (v7x-class) chips."""
    try:
        info = pltpu.get_tpu_info()
        vmem = getattr(info, "vmem_capacity_bytes", None)
    except Exception:
        vmem = None
    if vmem is not None and vmem <= 96 * 1024 * 1024:   # 64 MiB/TC -> v7x-class
        return _BLOCK_BYTES_HIGH_BW
    return _BLOCK_BYTES_DEFAULT


def _reference_table(look_back, d_model):
    """Exact (look_back, d_model) sin/cos seed, same f32 ops as the PyTorch
    buffer initialisation."""
    position = jnp.arange(look_back, dtype=jnp.float32)[:, None]
    div_term = jnp.exp(jnp.arange(0, d_model, 2, dtype=jnp.float32)
                       * (-(math.log(10000.0) / d_model)))
    te = jnp.zeros((look_back, d_model), jnp.float32)
    te = te.at[:, 0::2].set(jnp.sin(position * div_term))
    te = te.at[:, 1::2].set(jnp.cos(position * div_term[: d_model // 2]))
    return te


def _te_replicate_kernel(chunk_ref, o_ref, *, chunk_rows, copy_rows, tile_rows):
    """Lane-dense fast path.

    chunk_ref: (chunk_rows, 128) periodic slab (VMEM resident, fetched once).
    o_ref:     (tile_rows, 128) slab of the row-major flattened output.

    The tile start is always a multiple of the flattened pattern period, so
    the body is a pure VMEM->VMEM replication.  All offsets are static Python
    ints -> fully unrolled copy statements, each <= 32 vregs, so the store
    slot(s) stay saturated with zero loop bookkeeping.
    """
    off = 0
    while off < tile_rows:
        src = off % chunk_rows                      # phase-preserving wraparound
        n = min(copy_rows, tile_rows - off, chunk_rows - src)
        o_ref[pl.ds(off, n), :] = chunk_ref[pl.ds(src, n), :]
        off += n


def _te_rows_kernel(o_ref, *, look_back, d_model):
    """General fallback: (1, tile_s, d_model) block, per-element compute.
    Only used when the flattened lane-dense layout is unavailable
    (seq_len * d_model not a multiple of 128) or the period is enormous."""
    tile_s = o_ref.shape[1]
    rows = (lax.broadcasted_iota(jnp.int32, (1, tile_s, d_model), 1)
            + pl.program_id(0) * tile_s)
    # rows % look_back without vector integer division: f32 floor-div with a
    # +-1 fixup.  TODO(synk): exact only while seq_len < 2**24 (int32 rows are
    # not exactly representable in f32 beyond that).
    q = jnp.floor(rows.astype(jnp.float32) / float(look_back)).astype(jnp.int32)
    q = jnp.where(q * look_back > rows, q - 1, q)
    q = jnp.where((q + 1) * look_back <= rows, q + 1, q)
    pos = (rows - q * look_back).astype(jnp.float32)

    # Transcendental div_term hoisted to a single (1, 1, d_model) row.
    col = lax.broadcasted_iota(jnp.int32, (1, 1, d_model), 2)
    odd = col & 1
    div_row = jnp.exp((col - odd).astype(jnp.float32) * (_NEG_LOG_1E4 / d_model))
    angle = pos * div_row
    # Real cos on odd columns (not sin(x+pi/2)) so large look_back stays
    # bit-close to the reference.
    o_ref[...] = jnp.where(odd == 1, jnp.cos(angle),
                           jnp.sin(angle)).astype(o_ref.dtype)


def time_encoding(x, *, d_model, look_back, out_dtype=jnp.float32):
    """Pallas equivalent of TimeEncoding.forward(x).

    Only x.shape[1] is consumed (as in PyTorch).  Returns
    (1, x.shape[1], d_model) in `out_dtype`.  Since the kernel is HBM-store
    bound, out_dtype=jnp.bfloat16 halves bytes written (~2x end-to-end) where
    the downstream dtype allows; the default stays float32 to match the
    reference.  Positions are taken mod look_back, which equals PyTorch's
    repeat+truncate whenever seq_len % look_back == 0.
    """
    seq_len = int(x.shape[1])
    if seq_len == 0:
        return jnp.zeros((1, 0, d_model), out_dtype)

    itemsize = jnp.dtype(out_dtype).itemsize
    sub = _sublane(out_dtype)
    total = seq_len * d_model
    period = look_back * d_model

    # ---------------- lane-dense flattened fast path ----------------
    use_flat = (total % 128 == 0)
    if use_flat:
        # Flattened (rows, 128) view repeats every lcm(period, 128) elements.
        period_rows = period // math.gcd(period, 128)
        base_rows = _lcm(period_rows, sub)
        use_flat = base_rows * 128 * itemsize <= _MAX_CHUNK_BYTES

    if use_flat:
        block_bytes = _pick_block_bytes()
        total_rows = total // 128
        row_bytes = 128 * itemsize

        copy_rows = max(sub, (_COPY_BYTES // row_bytes) // sub * sub)
        chunk_rows = base_rows * max(1, pl.cdiv(copy_rows, base_rows))
        chunk_rows = min(chunk_rows, base_rows * pl.cdiv(total_rows, base_rows))
        copy_rows = min(copy_rows, chunk_rows)

        n_chunks = pl.cdiv(total_rows, chunk_rows)
        reps_target = max(1, (block_bytes // row_bytes) // chunk_rows)
        if n_chunks <= 1:
            reps = 1
        elif n_chunks <= reps_target:
            # Split into (at least) 2 grid steps so both v7x TensorCores work.
            reps = pl.cdiv(n_chunks, 2)
        else:
            reps = reps_target
            if pl.cdiv(n_chunks, reps) % 2 == 1:
                # Prefer an even tile count (balanced 2-TC split on v7x).
                span = max(1, reps_target // 4)
                for r in ([reps_target - d for d in range(1, span + 1)]
                          + [reps_target + d for d in range(1, span + 1)]):
                    if r >= 1 and pl.cdiv(n_chunks, r) % 2 == 0:
                        reps = r
                        break
        tile_rows = reps * chunk_rows
        grid = pl.cdiv(total_rows, tile_rows)
        if grid == 1:
            tile_rows = total_rows            # block == full dim (always legal)

        # Hoisted periodic chunk: built once (tiny), exact reference values.
        table = _reference_table(look_back, d_model).reshape(-1)
        chunk = jnp.tile(table, chunk_rows * 128 // period)
        chunk = chunk.reshape(chunk_rows, 128).astype(out_dtype)

        vmem_limit = int(min(56 * 1024 * 1024,
                             max(32 * 1024 * 1024,
                                 2 * tile_rows * row_bytes
                                 + 2 * chunk_rows * row_bytes
                                 + 4 * 1024 * 1024)))

        kernel = functools.partial(_te_replicate_kernel, chunk_rows=chunk_rows,
                                   copy_rows=copy_rows, tile_rows=tile_rows)
        flat = pl.pallas_call(
            kernel,
            out_shape=jax.ShapeDtypeStruct((total_rows, 128), out_dtype),
            grid_spec=pltpu.PrefetchScalarGridSpec(
                num_scalar_prefetch=0,
                grid=(grid,),
                in_specs=[pl.BlockSpec((chunk_rows, 128), lambda i: (0, 0))],
                out_specs=pl.BlockSpec((tile_rows, 128), lambda i: (i, 0)),
            ),
            compiler_params=pltpu.CompilerParams(
                dimension_semantics=("parallel",),
                vmem_limit_bytes=vmem_limit),
        )(chunk)
        # Row-major contiguous reshape (metadata only).
        return flat.reshape(1, seq_len, d_model)

    # ---------------- general fallback: natural layout ----------------
    row_bytes = d_model * itemsize
    target_s = max(sub, (_FALLBACK_BLOCK_BYTES // row_bytes) // sub * sub)
    if seq_len > target_s:
        tile_s = target_s
    elif seq_len >= 2 * sub:
        tile_s = pl.cdiv(pl.cdiv(seq_len, 2), sub) * sub   # >=2 aligned tiles
    else:
        tile_s = seq_len
    grid = pl.cdiv(seq_len, tile_s)
    vmem_limit = int(min(56 * 1024 * 1024,
                         max(32 * 1024 * 1024,
                             2 * tile_s * row_bytes + 8 * 1024 * 1024)))

    kernel = functools.partial(_te_rows_kernel, look_back=look_back,
                               d_model=d_model)
    return pl.pallas_call(
        kernel,
        out_shape=jax.ShapeDtypeStruct((1, seq_len, d_model), out_dtype),
        grid_spec=pltpu.PrefetchScalarGridSpec(
            num_scalar_prefetch=0,
            grid=(grid,),
            in_specs=[],
            out_specs=pl.BlockSpec((1, tile_s, d_model), lambda i: (0, i, 0)),
        ),
        compiler_params=pltpu.CompilerParams(
            dimension_semantics=("parallel",),
            vmem_limit_bytes=vmem_limit),
    )()


def time_encoding_ref(x, *, d_model, look_back, max_len=5000):
    """Pure-JAX reference reproducing the PyTorch module exactly."""
    position = jnp.arange(max_len, dtype=jnp.float32)[:, None]
    div_term = jnp.exp(
        jnp.arange(0, d_model, 2, dtype=jnp.float32)
        * (-(math.log(10000.0) / d_model)))
    te = jnp.zeros((max_len, d_model), jnp.float32)
    te = te.at[:, 0::2].set(jnp.sin(position * div_term))
    te = te.at[:, 1::2].set(jnp.cos(position * div_term[: d_model // 2]))
    te = te[None]                              # (1, max_len, d_model)
    te = te[:, :look_back]
    num_a = x.shape[1] // look_back
    te = jnp.tile(te, (1, num_a, 1))
    return te[:, : x.shape[1]]


if __name__ == "__main__":
    key = jax.random.PRNGKey(0)

    def _check(seq_len, d_model, look_back, out_dtype=jnp.float32, tol=1e-5):
        # x's values are never used by the module; only its shape matters.
        x = jax.random.normal(key, (2, seq_len, d_model), dtype=jnp.float32)
        out = jax.block_until_ready(
            time_encoding(x, d_model=d_model, look_back=look_back,
                          out_dtype=out_dtype))
        ref = time_encoding_ref(x, d_model=d_model, look_back=look_back)
        assert out.shape == (1, seq_len, d_model), out.shape
        assert jnp.allclose(out.astype(jnp.float32), ref, atol=tol, rtol=tol), (
            f"mismatch vs reference: seq={seq_len}, d_model={d_model}, "
            f"look_back={look_back}, dtype={jnp.dtype(out_dtype).name}")

    # 1) Flat replication path, tiny single block (small main example shape).
    _check(16, 32, 8)
    # 2) Natural-layout fallback (16*... -> 576 elements, not a multiple of 128).
    _check(24, 24, 8)
    # 3) Flat path with a non-128-friendly period (192) via the lcm(.,128) trick.
    _check(16, 24, 8)
    # 4) Flat path, 2-step grid + fully unrolled multi-chunk replication loop.
    _check(8192, 128, 64)
    # 5) Flat path with a ragged last output tile (Pallas edge clipping).
    _check(4160, 32, 8)
    # 6) bf16 output: 16-sublane chunk alignment, halved HBM writeback.
    _check(2048, 32, 8, out_dtype=jnp.bfloat16, tol=2e-2)

    print("KERNEL_OK")
</pallas_src>

<mosaic_0001>
module attributes {stable_mosaic.version = 11 : i64} {
  func.func @_te_replicate_kernel(%arg0: i32, %arg1: memref<8x128xf32, #tpu.memory_space<vmem>>, %arg2: memref<4x128xf32, #tpu.memory_space<vmem>>) attributes {dimension_semantics = [#tpu.dimension_semantics<parallel>], iteration_bounds = array<i64: 1>, scalar_prefetch = 0 : i64, scratch_operands = 0 : i64, tpu.core_type = #tpu.core_type<tc>, window_params = [{pipeline_mode = #tpu.pipeline_mode<synchronous>, transform_indices = @transform_0, window_bounds = array<i64: 8, 128>}, {transform_indices = @transform_1, window_bounds = array<i64: 4, 128>}]} {
    %c0 = arith.constant 0 : index
    %c0_0 = arith.constant 0 : index
    %0 = vector.load %arg1[%c0, %c0_0] : memref<8x128xf32, #tpu.memory_space<vmem>>, vector<4x128xf32>
    %c0_1 = arith.constant 0 : index
    %c0_2 = arith.constant 0 : index
    %1 = vector.load %arg2[%c0_1, %c0_2] : memref<4x128xf32, #tpu.memory_space<vmem>>, vector<4x128xf32>
    tpu.vector_store %arg2[%c0_1, %c0_2], %0 {strides = array<i32>} : memref<4x128xf32, #tpu.memory_space<vmem>>, vector<4x128xf32>,
    return
  }
  func.func @transform_0(%arg0: i32) -> (i32, i32) {
    %c0_i32 = arith.constant 0 : i32
    %c0_i32_0 = arith.constant 0 : i32
    %c0_i32_1 = arith.constant 0 : i32
    return %c0_i32, %c0_i32_0 : i32, i32
  }
  func.func @transform_1(%arg0: i32) -> (i32, i32) {
    %c0_i32 = arith.constant 0 : i32
    %c0_i32_0 = arith.constant 0 : i32
    return %arg0, %c0_i32 : i32, i32
  }
}

</mosaic_0001>

<bundles_post_ra>
// kernel: tpu_custom_call.1
= control target key start
LH: loop header
LB: loop body
LE: loop exit
PB: predicated region body
PF: predicated region fallthrough
CT: control target
= control target key end

     0   :  { %6 = vsyncpa [#allocation3], 0  ;;  %s102_s0 = inlined_call_operand.hbm [shape: f32[8,128], index: 0, kind: input, shape index: {}]   ;;  %s103_s1 = inlined_call_operand.hbm [shape: f32[4,128], index: 1, kind: output, shape index: {}]  }
   0x1   :  { %7 = vsyncpa [#allocation4], 0  ;;  %s84_s6 = smov [#allocation2]  }
   0x2   :  { %s14_s7 = sshll.u32 %s84_s6, 4  ;;  %s15_s7 = int_to_ptr.vmem [resolvable:$true] %s14_s7 }
   0x3   :  { %s48_s8 = scalar_lea.vmem %s15_s7, 128  ;;  %p53_p1 = scmp.lt.s32.totalorder %s15_s7, %s15_s7 }
   0x4   :  { %p49_p0 = scmp.ne.s32.totalorder %s15_s7, %s48_s8  ;;  %p54_p2 = scmp.lt.s32.totalorder %s48_s8, %s48_s8 }
   0x6   :  { %p55_p3 = por %p54_p2, %p53_p1 }
   0x8   :  { %p56_p4 = pnand %p55_p3, %p49_p0 }
   0xa   :  { %59 = shalt.err (!%p56_p4)
}
   0xb   :  { %17 = dma.hbm_to_vmem [thread:$0]  %s102_s0, 128, %s15_s7, [#allocation3]  }
   0xc   :  { %80 = dma.done.wait [#allocation3], 128  }
   0xd   :  { %81 = vsyncadd [#allocation3], 4294967168  ;;  %s85_s11 = smov [#allocation5]   ;;  %v21_v0 = vld [vmem:[#allocation2] sm:$0xf] }
   0xe   :  { %s29_s12 = sshll.u32 %s85_s11, 4  ;;  %22 = vst [vmem:[#allocation5] sm:$0xf] %v21_v0  ;;  %s30_s12 = int_to_ptr.vmem [resolvable:$true] %s29_s12 }
   0xf   :  { %s60_s13 = scalar_lea.vmem %s30_s12, 64  ;;  %p65_p6 = scmp.lt.s32.totalorder %s30_s12, %s30_s12 }
  0x10   :  { %p61_p5 = scmp.ne.s32.totalorder %s30_s12, %s60_s13  ;;  %p66_p7 = scmp.lt.s32.totalorder %s60_s13, %s60_s13 }
  0x12   :  { %p67_p8 = por %p66_p7, %p65_p6 }
  0x14   :  { %p68_p9 = pnand %p67_p8, %p61_p5 }
  0x16   :  { %71 = shalt.err (!%p68_p9)
}
  0x17   :  { %32 = dma.vmem_to_hbm [thread:$0]  %s30_s12, 64, %s103_s1, [#allocation4]  }
  0x18   :  { %82 = dma.done.wait [#allocation4], 64  }
  0x19   :  { %83 = vsyncadd [#allocation4], 4294967232 }
  0x1a   :  { %36 = vsyncpa [#allocation3], 1 }
  0x1b   :  { %37 = vsyncpa [#allocation4], 1 }

</bundles_post_ra>
